<compile_context>
chip_gen: v7x
topology: tpu7x:2x2x1
jax: 0.10.0
libtpu: 0.0.40
codegen_flags: <defaults>
</compile_context>

<pallas_src>
import jax
import jax.numpy as jnp
from jax.experimental import pallas as pl
from jax.experimental.pallas import tpu as pltpu


def _round_up(n, m):
    return ((n + m - 1) // m) * m


def _round_down(n, m):
    return (n // m) * m


def _cdiv(a, b):
    return (a + b - 1) // b


def _type_inference_kernel(x_ref, wt_ref, bt_ref, o_ref):
    # x_ref:  (1, TS, H)  sequence tile of one batch element (native dtype)
    # wt_ref: (R, H)      folded weight (codes^T @ W^T), resident across grid
    # bt_ref: (R, 1)      folded bias   (codes^T @ b),  f32, resident
    # o_ref:  (1, R, TS)  softmax over R; TS along lanes (lane-dense store)
    x = x_ref[0]                                               # (TS, H)
    # logits^T = W' . x^T, computed by contracting H on both operands
    # (A @ B^T form -> MXU-native, no physical transpose of x).
    logits = jax.lax.dot_general(
        wt_ref[...], x,
        dimension_numbers=(((1,), (1,)), ((), ())),
        preferred_element_type=jnp.float32)                    # (R, TS) f32
    logits = logits + bt_ref[...]                              # lane broadcast (R,1)
    m = jnp.max(logits, axis=0, keepdims=True)                 # (1, TS) sublane reduce
    e = jnp.exp(logits - m)
    denom = jnp.sum(e, axis=0, keepdims=True)                  # (1, TS)
    p = e * pl.reciprocal(denom, approx=False)                 # 1 rcp + mul per column
    o_ref[0] = p.astype(o_ref.dtype)


def fold_type_inference_params(w_t, bias, codes):
    """Fold Linear + codes matmul into one weight; call ONCE per parameter set.

    w_t: (H, D) (Linear weight transposed), bias: (D,), codes: (1, D, R).
    Returns wt_fold (R, H) and b_fold (R, 1), both float32.
    """
    D = w_t.shape[1]
    R = codes.shape[-1]
    codes2d = codes.reshape(D, R).astype(jnp.float32)
    w_fold = jnp.dot(w_t.astype(jnp.float32), codes2d)         # (H, R)
    b_fold = jnp.dot(bias.astype(jnp.float32), codes2d)        # (R,)
    return jnp.transpose(w_fold), b_fold.reshape(R, 1)         # (R, H), (R, 1)


def type_inference_folded(x, wt_fold, b_fold):
    """x: (B, S, H); wt_fold: (R, H); b_fold: (R, 1) -> (B, R, S, 1) in x.dtype."""
    B, S, H = x.shape
    R = wt_fold.shape[0]

    x_dt = x.dtype
    x_itemsize = jnp.dtype(x_dt).itemsize
    out_dtype = x_dt                       # torch softmax preserves input dtype
    out_itemsize = jnp.dtype(out_dtype).itemsize

    wt_fold = wt_fold.astype(x_dt)         # tiny (R, H) cast, negligible
    b_fold = b_fold.astype(jnp.float32).reshape(R, 1)

    # --- generation-aware VMEM budget: <= 50% of physical, capped at 48 MiB ---
    # (=> ~32 MiB on v7x's 64 MiB VMEM, 48 MiB on v5e/v6e's 128 MiB)
    try:
        vmem_capacity = int(pltpu.get_tpu_info().vmem_capacity_bytes)
    except Exception:
        vmem_capacity = 64 << 20           # conservative (v7x-sized) fallback
    budget = int(min(vmem_capacity // 2, 48 << 20))

    # --- size the sequence tile from the budget, counting lane padding -------
    h_lanes = _round_up(H, 128)            # x last dim padded to lanes
    r_sub = _round_up(R, 8)                # transposed slabs pad R to sublanes
    per_row_bytes = (2 * h_lanes * x_itemsize          # 2 x double-buffers
                     + 2 * r_sub * out_itemsize        # 2 output double-buffers
                     + 4 * r_sub * 4)                  # ~4 f32 (R,TS) temporaries
    resident_bytes = 2 * (r_sub * h_lanes * x_itemsize + r_sub * 128 * 4)
    headroom = 4 << 20
    avail = max(budget - resident_bytes - headroom, 1 << 20)
    ts_cap = max(128, _round_down(avail // per_row_bytes, 128))

    if S <= ts_cap:
        TS = S                             # whole sequence in one tile (full dim)
    else:
        TS = ts_cap                        # multiple of 128; last block ragged (no pad copy)
    # make sure the parallel grid has >= 2 steps so megacore / both v7x TCs engage
    if B * _cdiv(S, TS) < 2 and S >= 256:
        TS = max(128, _round_down(_cdiv(S, 2), 128))

    grid = (B, _cdiv(S, TS))

    cost = pl.CostEstimate(
        flops=2 * B * S * H * R,
        transcendentals=B * S * R,
        bytes_accessed=(B * S * H * x_itemsize
                        + B * S * R * out_itemsize
                        + R * H * x_itemsize + R * 4),
    )

    out = pl.pallas_call(
        _type_inference_kernel,
        out_shape=jax.ShapeDtypeStruct((B, R, S), out_dtype),
        grid=grid,
        in_specs=[
            pl.BlockSpec((1, TS, H), lambda b, s: (b, s, 0)),
            pl.BlockSpec((R, H), lambda b, s: (0, 0)),   # resident folded weight
            pl.BlockSpec((R, 1), lambda b, s: (0, 0)),   # resident folded bias
        ],
        out_specs=pl.BlockSpec((1, R, TS), lambda b, s: (b, 0, s)),
        compiler_params=pltpu.CompilerParams(
            dimension_semantics=("parallel", "parallel"),
            vmem_limit_bytes=budget,
        ),
        cost_estimate=cost,
    )(x, wt_fold, b_fold)

    return out[..., None]                  # (B, R, S, 1) — free unsqueeze in wrapper


def type_inference(x, w_t, bias, codes):
    """Convenience wrapper matching TypeInference.forward (folds params per call).

    For repeated calls with fixed parameters, fold once with
    fold_type_inference_params and call type_inference_folded directly.
    """
    wt_fold, b_fold = fold_type_inference_params(w_t, bias, codes)
    return type_inference_folded(x, wt_fold, b_fold)


def _reference(x, w_t, bias, codes):
    t = x @ w_t + bias                                 # (B, S, D)
    score = jnp.einsum("bsd,dr->bsr", t, codes[0])     # (B, S, R)
    score = jnp.swapaxes(score, -2, -1)                # (B, R, S)
    score = jax.nn.softmax(score, axis=1)
    return score[..., None]


if __name__ == "__main__":
    # Small shapes consistent with the module.
    B, S = 2, 8
    hidden_dim, dim, num_rules = 32, 16, 8

    key = jax.random.PRNGKey(0)
    k_x, k_w, k_b, k_c = jax.random.split(key, 4)

    x = jax.random.normal(k_x, (B, S, hidden_dim), dtype=jnp.float32)
    # nn.Linear(hidden_dim, dim): weight (dim, hidden_dim) -> stored transposed (H, D)
    w_t = jax.random.normal(k_w, (hidden_dim, dim), dtype=jnp.float32) * 0.1
    bias = jax.random.normal(k_b, (dim,), dtype=jnp.float32) * 0.1
    # nn.Parameter(torch.randn(1, dim, num_rules))
    codes = jax.random.normal(k_c, (1, dim, num_rules), dtype=jnp.float32)

    # Fold parameters once (amortized across calls); jit only the data path.
    wt_fold, b_fold = fold_type_inference_params(w_t, bias, codes)
    fn = jax.jit(type_inference_folded)
    out = fn(x, wt_fold, b_fold)
    jax.block_until_ready(out)

    ref = _reference(x, w_t, bias, codes)
    assert out.shape == (B, num_rules, S, 1), out.shape
    assert jnp.allclose(out, ref, atol=1e-5, rtol=1e-5), float(
        jnp.max(jnp.abs(out - ref)))

    print("KERNEL_OK")
</pallas_src>

<mosaic_0001>
module attributes {stable_mosaic.version = 11 : i64} {
  func.func @_type_inference_kernel(%arg0: i32, %arg1: i32, %arg2: memref<1x8x32xf32, #tpu.memory_space<vmem>>, %arg3: memref<8x32xf32, #tpu.memory_space<vmem>>, %arg4: memref<8x1xf32, #tpu.memory_space<vmem>>, %arg5: memref<1x8x8xf32, #tpu.memory_space<vmem>>) attributes {dimension_semantics = [#tpu.dimension_semantics<parallel>, #tpu.dimension_semantics<parallel>], iteration_bounds = array<i64: 2, 1>, scalar_prefetch = 0 : i64, scratch_operands = 0 : i64, tpu.core_type = #tpu.core_type<tc>, window_params = [{transform_indices = @transform_0, window_bounds = array<i64: 1, 8, 32>}, {pipeline_mode = #tpu.pipeline_mode<synchronous>, transform_indices = @transform_1, window_bounds = array<i64: 8, 32>}, {pipeline_mode = #tpu.pipeline_mode<synchronous>, transform_indices = @transform_2, window_bounds = array<i64: 8, 1>}, {transform_indices = @transform_3, window_bounds = array<i64: 1, 8, 8>}]} {
    %c0 = arith.constant 0 : index
    %c0_0 = arith.constant 0 : index
    %c0_1 = arith.constant 0 : index
    %0 = vector.load %arg2[%c0, %c0_0, %c0_1] : memref<1x8x32xf32, #tpu.memory_space<vmem>>, vector<1x8x32xf32>
    %1 = vector.shape_cast %0 : vector<1x8x32xf32> to vector<8x32xf32>
    %c0_2 = arith.constant 0 : index
    %c0_3 = arith.constant 0 : index
    %2 = vector.load %arg3[%c0_2, %c0_3] : memref<8x32xf32, #tpu.memory_space<vmem>>, vector<8x32xf32>
    %cst = arith.constant dense<0.000000e+00> : vector<8x8xf32>
    %3 = tpu.matmul %2, %1, %cst {dimension_numbers = #tpu.dot_dimension_numbers<[1], [1], [0], [0], [0, 0, 1, 0], [], []>} : vector<8x32xf32>, vector<8x32xf32>, vector<8x8xf32> -> vector<8x8xf32>
    %c0_4 = arith.constant 0 : index
    %c0_5 = arith.constant 0 : index
    %4 = vector.load %arg4[%c0_4, %c0_5] : memref<8x1xf32, #tpu.memory_space<vmem>>, vector<8x1xf32>
    %5 = vector.broadcast %4 : vector<8x1xf32> to vector<8x8xf32>
    %6 = arith.addf %3, %5 : vector<8x8xf32>
    %cst_6 = arith.constant dense<0xFF800000> : vector<8xf32>
    %7 = vector.multi_reduction <maximumf>, %6, %cst_6 [0] : vector<8x8xf32> to vector<8xf32>
    %8 = vector.shape_cast %7 : vector<8xf32> to vector<1x8xf32>
    %9 = vector.broadcast %8 : vector<1x8xf32> to vector<8x8xf32>
    %10 = arith.subf %6, %9 : vector<8x8xf32>
    %11 = math.exp %10 : vector<8x8xf32>
    %cst_7 = arith.constant dense<0.000000e+00> : vector<8xf32>
    %12 = vector.multi_reduction <add>, %11, %cst_7 [0] : vector<8x8xf32> to vector<8xf32>
    %13 = vector.shape_cast %12 : vector<8xf32> to vector<1x8xf32>
    %14 = tpu.reciprocal %13 : vector<1x8xf32> -> vector<1x8xf32>
    %15 = vector.broadcast %14 : vector<1x8xf32> to vector<8x8xf32>
    %16 = arith.mulf %11, %15 : vector<8x8xf32>
    %c0_8 = arith.constant 0 : index
    %c0_9 = arith.constant 0 : index
    %c0_10 = arith.constant 0 : index
    %17 = vector.load %arg5[%c0_8, %c0_9, %c0_10] : memref<1x8x8xf32, #tpu.memory_space<vmem>>, vector<1x8x8xf32>
    %18 = vector.shape_cast %17 : vector<1x8x8xf32> to vector<8x8xf32>
    %19 = vector.shape_cast %16 : vector<8x8xf32> to vector<1x8x8xf32>
    tpu.vector_store %arg5[%c0_8, %c0_9, %c0_10], %19 {strides = array<i32>} : memref<1x8x8xf32, #tpu.memory_space<vmem>>, vector<1x8x8xf32>,
    return
  }
  func.func @transform_0(%arg0: i32, %arg1: i32) -> (i32, i32, i32) {
    %c0_i32 = arith.constant 0 : i32
    %c0_i32_0 = arith.constant 0 : i32
    return %arg0, %arg1, %c0_i32 : i32, i32, i32
  }
  func.func @transform_1(%arg0: i32, %arg1: i32) -> (i32, i32) {
    %c0_i32 = arith.constant 0 : i32
    %c0_i32_0 = arith.constant 0 : i32
    %c0_i32_1 = arith.constant 0 : i32
    return %c0_i32, %c0_i32_0 : i32, i32
  }
  func.func @transform_2(%arg0: i32, %arg1: i32) -> (i32, i32) {
    %c0_i32 = arith.constant 0 : i32
    %c0_i32_0 = arith.constant 0 : i32
    %c0_i32_1 = arith.constant 0 : i32
    return %c0_i32, %c0_i32_0 : i32, i32
  }
  func.func @transform_3(%arg0: i32, %arg1: i32) -> (i32, i32, i32) {
    %c0_i32 = arith.constant 0 : i32
    %c0_i32_0 = arith.constant 0 : i32
    return %arg0, %c0_i32, %arg1 : i32, i32, i32
  }
}

</mosaic_0001>

<bundles_post_ra>
// kernel: type_inference_folded.1
= control target key start
LH: loop header
LB: loop body
LE: loop exit
PB: predicated region body
PF: predicated region fallthrough
CT: control target
= control target key end

     0   :  { %8 = vsyncpa [#allocation3], 0  ;;  %s820_s0 = inlined_call_operand.hbm [shape: f32[2,8,32], index: 0, kind: input, shape index: {}]   ;;  %s821_s1 = inlined_call_operand.vmem [shape: f32[8,32], index: 1, kind: input, shape index: {}]   ;;  %s822_s2 = inlined_call_operand.vmem [shape: f32[8,1], index: 2, kind: input, shape index: {}]   ;;  %s823_s3 = inlined_call_operand.hbm [shape: f32[2,8,8], index: 3, kind: output, shape index: {}]  }
   0x1   :  { %10 = vsyncpa [#allocation3 + $0x1], 0 }
   0x2   :  { %11 = vsyncpa [#allocation4], 0 }
   0x3   :  { %13 = vsyncpa [#allocation4 + $0x1], 0  ;;  %s635_s12 = smov 0   ;;  %s637_s13 = smov 0  }
   0x4   :  { %s639_s14 = smov 0   ;;  %s641_s15 = smov 0  }
   0x5   :  { %s643_s16 = smov 0   ;;  %s645_s17 = smov 0  }
   0x6 LB: > { %s404_s18 = sadd.s32 4294967295, %s608_s17   ;;  %s405_s19 = sadd.s32 4294967294, %s608_s17   ;;  %s608_s17 = sphi %s645_s17, %s19_s17   ;;  %s604_s16 = sphi %s643_s16, %s839_s16   ;;  %s600_s15 = sphi %s641_s15, %s838_s15   ;;  %s596_s14 = sphi %s639_s14, %s837_s14   ;;  %s592_s13 = sphi %s637_s13, %s836_s13   ;;  %s588_s12 = sphi %s635_s12, %s835_s12  }
   0x7   : > { %s31_s20 = sadd.s32 1, %s604_s16  ;;  %s40_s21 = sadd.s32 1, %s596_s14 }
   0x8   : > { %p33_p0 = scmp.ge.s32.totalorder %s31_s20, 2  ;;  %p47_p1 = scmp.ne.s32.totalorder %s596_s14, %s592_s13 }
   0x9   : > { %p48_p2 = scmp.eq.s32.totalorder %s608_s17, 0  ;;  %p53_p3 = scmp.ne.s32.totalorder %s592_s13, %s588_s12 }
   0xa   : > { %s841_s20 = smov (%p33_p0, %s31_s20), 0  ;;  %p54_p5 = scmp.eq.s32.totalorder %s404_s18, 0 }
   0xb   : > { %p676_p4 = por %p48_p2, %p47_p1  ;;  %s35_s23 = ssub.s32 %s604_s16, %s841_s20 }
   0xc   : > { %p121_p6 = scmp.eq.s32.totalorder %s404_s18, 1  ;;  %p38_p7 = scmp.eq.s32.totalorder %s35_s23, 0 }
   0xd   : > { %p682_p8 = por %p54_p5, %p53_p3  ;;  %p127_p10 = scmp.eq.s32.totalorder %s405_s19, 1 }
   0xe   : > { %p686_p9 = por %p121_p6, %p47_p1  ;;  %p438_p13 = scmp.lt.s32.totalorder %s608_s17, 2 }
   0xf   : > { %s691_s26 = scalar_select %p38_p7, %s596_s14, %s40_s21  }
  0x10   : > { %s827_s25 = scalar_select %p686_p9, 1, 0 }
  0x11   : > { %p693_p11 = por %p127_p10, %p53_p3  ;;  %s153_s28 = sand.u32 1, %s596_s14  }
  0x12   : > { %s408_s29 = sshll.u32 %s153_s28, 3  ;;  %s409_s30 = sshll.u32 %s604_s16, 7 }
  0x13   : > { %s828_s27 = scalar_select %p693_p11, 1, 0 }
  0x14   : > { %s704_s6 = scalar_lea.hbm %s820_s0, %s409_s30  ;;  %s157_s7 = scalar_lea.vmem [#allocation2], %s408_s29 }
  0x15   : > { %s165_s8 = sshll.u32 %s157_s7, 4  ;;  %p710_p0 = pnand %p438_p13, %p676_p4  ;;  %s706_s8 = int_to_ptr.vmem [resolvable:$true] %s165_s8 }
  0x16   : > { %s154_s10 = scalar_lea.sflag [#allocation3], %s153_s28  ;;  %s496_s11 = scalar_lea.hbm %s704_s6, 128 }
  0x17   : > { %p497_p3 = scmp.ne.s32.totalorder %s704_s6, %s496_s11  ;;  %p498_p5 = pneg %p710_p0 }
  0x18   : > { %s501_s21 = scalar_lea.hbm %s820_s0, 256  ;;  %p502_p4 = scmp.lt.u32.totalorder %s704_s6, %s820_s0 }
  0x19   : > { %p499_p6 = pnand %p498_p5, %p497_p3  ;;  %p503_p10 = scmp.lt.u32.totalorder %s501_s21, %s496_s11 }
  0x1a   : > { %p505_p12 = scmp.lt.u32.totalorder %s496_s11, %s704_s6 }
  0x1b   : > { %p500_p7 = pneg %p499_p6  ;;  %p504_p13 = por %p503_p10, %p502_p4 }
  0x1d   : > { %p506_p1 = por %p505_p12, %p504_p13 }
  0x1f   : > { %p507_p2 = pnand %p506_p1, %p500_p7 }
  0x21   : > { %510 = shalt.err (!%p507_p2)
}
  0x22   : > { %s511_s28 = scalar_lea.vmem %s706_s8, 128  ;;  %s610_s29 = smov [#allocation2]  }
  0x23   : > { %p512_p3 = scmp.ne.s32.totalorder %s706_s8, %s511_s28  ;;  %s516_s30 = sshll.u32 %s610_s29, 4  ;;  %s517_s30 = int_to_ptr.vmem [resolvable:$false] %s516_s30 }
  0x24   : > { %s518_s4 = scalar_lea.vmem %s517_s30, 256  ;;  %p519_p9 = scmp.lt.s32.totalorder %s706_s8, %s517_s30 }
  0x25   : > { %p514_p6 = pnand %p512_p3, %p498_p5  ;;  %p520_p4 = scmp.lt.s32.totalorder %s518_s4, %s511_s28 }
  0x27   : > { %p515_p11 = pneg %p514_p6  ;;  %p521_p10 = por %p520_p4, %p519_p9 }
  0x29   : > { %p522_p12 = pnand %p521_p10, %p515_p11 }
  0x2b   : > { %525 = shalt.err (!%p522_p12)
}
  0x2c   : > { %433 = dma.hbm_to_vmem [thread:$0]  (!%p710_p0), %s704_s6, 128, %s706_s8, %s154_s10  }
  0x2d   : > { %p830_p1 = scmp.lt.s32.totalorder %s608_s17, 3  ;;  %p831_p2 = scmp.ge.s32.totalorder %s608_s17, 1 }
  0x2f   : > { %p171_p5 = pnand %p831_p2, %p830_p1 }
  0x30   : > { %s746_s5 = sand.u32 (!%p171_p5), 1, %s592_s13  }
  0x31   : > { %174 = sbr.rel (%p171_p5) target bundleno = 344 (0x158), region = 32  ;;  %s411_s7 = sshll.u32 (!%p171_p5), %s746_s5, 3 }
  0x32   : > { %s177_s11 = scalar_lea.sflag (!%p171_p5), [#allocation3], %s746_s5  ;;  %s180_s9 = scalar_lea.vmem (!%p171_p5), [#allocation2], %s411_s7 }
  0x38   : > { %579 = dma.done.wait (%p682_p8), %s177_s11, 128  }
  0x39   : > { %581 = vsyncadd (%p682_p8), %s177_s11, 4294967168  ;;  %v611_v0 = vmov 0.0   ;;  %vm612_vm0 = vmmov 0   ;;  %v613_v1 = vmov 0   ;;  %vm211_vm1 = vcmask 261120   ;;  %v203_v2 = vld [vmem:[%s180_s9] sm:$0xff] }
  0x3a   : > { %421 = vmatprep.subr.mxu0 %v611_v0  ;;  %423 = vmatprep.mubr.msk.f32.mxu0 %vm612_vm0, %v611_v0  ;;  %v205_v3 = vld [vmem:[%s822_s2] sm:$0xff]  ;;  %vm288_vm2 = vcmask 64512   ;;  %s416_s24 = sshll.u32 %s600_s15, 7  ;;  %s202_s19 = scalar_lea.vmem [#allocation5], %s411_s7 }
  0x3b   : > { %491 = vset.pattern.permute.xlu0 %v613_v1  ;;  %422 = vmatpush3.xpose.msk.msra.mxu0 %vm211_vm1, %v203_v2  ;;  %v204_v4 = vld [vmem:[%s821_s1] sm:$0xff]  ;;  %s324_s21 = sshll.u32 %s202_s19, 4  ;;  %s770_s28 = scalar_lea.hbm %s823_s3, %s416_s24  ;;  %s772_s21 = int_to_ptr.vmem [resolvable:$true] %s324_s21 }
  0x3c   : > { %208 = vperm.xlu0 %491, %v205_v3   ;;  %s310_s29 = scalar_lea.sflag [#allocation4], %s746_s5  ;;  %s526_s30 = scalar_lea.vmem %s772_s21, 128 }
  0x3d   : > { %p527_p8 = scmp.ne.s32.totalorder %s772_s21, %s526_s30  ;;  %p832_p9 = scmp.ne.s32.totalorder %s827_s25, 0 }
  0x3e   : > { %424 = vmatmul.mubr.msk.f32.vlgmr.msra.gmra.mrb[0].mxu0 %vm211_vm1, %v204_v4  ;;  %s614_s15 = smov [#allocation5]  }
  0x3f   : > { %p528_p11 = pnand %p527_p8, %p832_p9  ;;  %s530_s4 = sshll.u32 %s614_s15, 4  ;;  %s531_s4 = int_to_ptr.vmem [resolvable:$false] %s530_s4 }
  0x40   : > { %s532_s7 = scalar_lea.vmem %s531_s4, 256  ;;  %p533_p7 = scmp.lt.s32.totalorder %s772_s21, %s531_s4 }
  0x41   : > { %p529_p0 = pneg %p528_p11  ;;  %p534_p13 = scmp.lt.s32.totalorder %s532_s7, %s526_s30 }
  0x43   : > { %p535_p3 = por %p534_p13, %p533_p7 }
  0x45   : > { %p536_p6 = pnand %p535_p3, %p529_p0 }
  0xbb   : > { %v209_v5 = vpop.permute.xlu0 %208 }
 0x111   : > { %v284_v6 = vpop.f32.mrb[0].mxu0 }
 0x112   : > { %v285_v7 = vadd.f32 %v284_v6, %v209_v5  ;;  %v425_v8 = vpop.f32.mrb[1].mxu0 }
 0x114   : > { %v289_v9 = vsel %vm288_vm2, %v285_v7, -inf }
 0x115   : > { %v290_v10 = vrot.slane %v289_v9, 4 }
 0x117   : > { %v291_v11 = vmax.f32 %v289_v9, %v290_v10 }
 0x119   : > { %v292_v12 = vrot.slane %v291_v11, 2 }
 0x11b   : > { %v293_v13 = vmax.f32 %v291_v11, %v292_v12 }
 0x11d   : > { %v294_v14 = vrot.slane %v293_v13, 1 }
 0x11f   : > { %v295_v15 = vmax.f32 %v293_v13, %v294_v14 }
 0x121   : > { %v296_v16 = vsub.f32 %v285_v7, %v295_v15 }
 0x123   : > { %v297_v17 = vmul.f32 1.442695, %v296_v16 }
 0x125   : > { %492 = vpow2.f32 %v297_v17 }
 0x12f   : > { %v493_v18 = vpop.eup %492 }
 0x130   : > { %v299_v19 = vsel %vm288_vm2, %v493_v18, 0.0 }
 0x131   : > { %v300_v20 = vrot.slane %v299_v19, 4 }
 0x133   : > { %v301_v21 = vadd.f32 %v300_v20, %v299_v19 }
 0x135   : > { %v302_v22 = vrot.slane %v301_v21, 2 }
 0x137   : > { %v303_v23 = vadd.f32 %v302_v22, %v301_v21 }
 0x139   : > { %v304_v24 = vrot.slane %v303_v23, 1 }
 0x13b   : > { %v305_v25 = vadd.f32 %v304_v24, %v303_v23 }
 0x13d   : > { %494 = vrcp.f32 %v305_v25 }
 0x147   : > { %v495_v26 = vpop.eup %494 }
 0x148   : > { %v307_v27 = vmul.f32 %v495_v26, %v493_v18 }
 0x14a   : > { %308 = vst.msk [vmem:[%s202_s19] sm:$0xff] %vm288_vm2, %v307_v27 }
 0x14b   : > { %539 = shalt.err (!%p536_p6)
}
 0x14c   : > { %s540_s5 = scalar_lea.hbm %s770_s28, 128  ;;  %s544_s6 = scalar_lea.hbm %s823_s3, 256 }
 0x14d   : > { %p541_p4 = scmp.ne.s32.totalorder %s770_s28, %s540_s5  ;;  %p545_p1 = scmp.lt.u32.totalorder %s770_s28, %s823_s3 }
 0x14e   : > { %p546_p2 = scmp.lt.u32.totalorder %s544_s6, %s540_s5  ;;  %p548_p8 = scmp.lt.u32.totalorder %s540_s5, %s770_s28 }
 0x14f   : > { %p542_p10 = pnand %p541_p4, %p832_p9 }
 0x150   : > { %p547_p5 = por %p546_p2, %p545_p1 }
 0x151   : > { %p543_p12 = pneg %p542_p10 }
 0x152   : > { %p549_p11 = por %p548_p8, %p547_p5 }
 0x154   : > { %p550_p0 = pnand %p549_p11, %p543_p12 }
 0x156   : > { %553 = shalt.err (!%p550_p0)
}
 0x157   : > { %428 = dma.vmem_to_hbm [thread:$0]  (%p832_p9), %s772_s21, 128, %s770_s28, %s310_s29  }
 0x158 PF: > { %s336_s18 = sand.u32 1, %s588_s12   ;;  %p833_p7 = scmp.ne.s32.totalorder %s828_s27, 0 }
 0x159   : > { %p834_p13 = scmp.ge.s32.totalorder %s608_s17, 2  ;;  %s337_s24 = scalar_lea.sflag [#allocation4], %s336_s18 }
 0x15b   : > { %p435_p3 = pnand %p834_p13, %p833_p7 }
 0x15d   : > { %583 = dma.done.wait (!%p435_p3), %s337_s24, 128  }
 0x15e   : > { %585 = vsyncadd (!%p435_p3), %s337_s24, 4294967168  ;;  %s19_s17 = sadd.s32 1, %s608_s17   ;;  %s835_s12 = smov %s592_s13 }
 0x15f   : > { %p16_p6 = scmp.ge.s32.totalorder %s19_s17, 4   ;;  %s836_s13 = smov %s596_s14 }
 0x160   : > { %s837_s14 = smov %s691_s26  ;;  %s838_s15 = smov %s604_s16 }
 0x161   : > { %s839_s16 = smov %s841_s20  ;;  %18 = sbr.rel (!%p16_p6) target bundleno = 6 (0x6), region = 77 }
 0x168   :  { %342 = vsyncpa [#allocation3], 1 }
 0x169   :  { %344 = vsyncpa [#allocation3 + $0x1], 1 }
 0x16a   :  { %345 = vsyncpa [#allocation4], 1 }
 0x16b   :  { %347 = vsyncpa [#allocation4 + $0x1], 1 }

</bundles_post_ra>
